<compile_context>
chip_gen: v5e
topology: v5e:2x2
jax: 0.10.0
libtpu: 0.0.40
codegen_flags: <defaults>
</compile_context>

<pallas_src>
import jax
import jax.numpy as jnp
from jax.experimental import pallas as pl
from jax.experimental.pallas import tpu as pltpu


def _avgpool_kernel(x_ref, pw_ref, o_ref):
    # x_ref : (TB, Ho, S, W)  -- NCHW-native view, W on the 128-lane axis
    # pw_ref: (W, Wo)         -- column-pooling matrix, carries the 1/(s*s) scale
    # o_ref : (TB, Ho, Wo)
    s = x_ref.shape[2]

    # Row-window sum: static, unrolled VPU adds over the window axis.
    acc = x_ref[:, :, 0, :].astype(jnp.float32)
    for kh in range(1, s):
        acc = acc + x_ref[:, :, kh, :].astype(jnp.float32)

    # Column pooling + averaging as a lane-contracting matmul with the small
    # resident pooling matrix (K = W, not K = C, so the MXU sees a real
    # contraction for realistic widths).
    tb, ho, w = acc.shape
    y = jnp.dot(acc.reshape(tb * ho, w), pw_ref[...],
                preferred_element_type=jnp.float32)
    o_ref[...] = y.reshape(tb, ho, o_ref.shape[2]).astype(o_ref.dtype)


def _round_up(a, m):
    return -(-a // m) * m


def _pick_batch_tile(B, Ho, s, W, Wo, itemsize,
                     working_set_bytes=16 * 1024 * 1024):
    """Largest tile of the N*C axis whose double-buffered in+out working set
    fits the VMEM budget; also keep >= 2 grid steps so v7x megacore can shard."""
    in_row = Ho * _round_up(s, 8) * _round_up(W, 128) * itemsize       # padded VMEM layout
    out_row = _round_up(Ho, 8) * _round_up(Wo, 128) * itemsize
    per_row = 2 * (in_row + out_row)                                    # double buffering
    tb = max(1, working_set_bytes // per_row)
    if B > 1:
        tb = min(tb, -(-B // 2))   # ensure at least 2 grid steps
    return int(min(tb, B))


def avgpool2d_forward(x, stride):
    """Forward pass of the module: average pool with window = stride = s."""
    N, C, H, W = x.shape
    s = int(stride)
    Ho, Wo = H // s, W // s
    if H != Ho * s or W != Wo * s:
        # The conv (kernel = stride = s, no padding) drops the ragged edge.
        x = x[:, :, :Ho * s, :Wo * s]
    Wt = Wo * s
    B = N * C

    # Free, contiguous reshape of NCHW: (N*C, Ho, s, W).  W stays on lanes.
    xv = x.reshape(B, Ho, s, Wt)

    # Pooling matrix pw[w, wo] = 1/(s*s) if w // s == wo else 0.
    pw = (jnp.arange(Wt)[:, None] // s == jnp.arange(Wo)[None, :])
    pw = pw.astype(jnp.float32) / float(s * s)

    tb = _pick_batch_tile(B, Ho, s, Wt, Wo, jnp.dtype(x.dtype).itemsize)
    grid = (pl.cdiv(B, tb),)

    out = pl.pallas_call(
        _avgpool_kernel,
        out_shape=jax.ShapeDtypeStruct((B, Ho, Wo), x.dtype),
        grid_spec=pltpu.PrefetchScalarGridSpec(
            num_scalar_prefetch=0,
            grid=grid,
            in_specs=[
                pl.BlockSpec((tb, Ho, s, Wt), lambda i: (i, 0, 0, 0)),
                pl.BlockSpec((Wt, Wo), lambda i: (0, 0)),   # resident pooling matrix
            ],
            out_specs=pl.BlockSpec((tb, Ho, Wo), lambda i: (i, 0, 0)),
        ),
        compiler_params=pltpu.CompilerParams(
            dimension_semantics=("parallel",),
            vmem_limit_bytes=32 * 1024 * 1024,
        ),
    )(xv, pw)

    # Free reshape back to NCHW of the pooled spatial dims.
    return out.reshape(N, C, Ho, Wo)


if __name__ == "__main__":
    N, C, H, W = 2, 4, 16, 16
    stride = 2

    key = jax.random.PRNGKey(0)
    x = jax.random.normal(key, (N, C, H, W), dtype=jnp.float32)

    y = avgpool2d_forward(x, stride)
    y = jax.block_until_ready(y)

    # Reference: exactly the module's dummy conv —
    # weight = eye(C).view(C,C,1,1).expand(C,C,s,s) / s^2, stride = s, no padding.
    w = jnp.broadcast_to(jnp.eye(C, dtype=jnp.float32).reshape(C, C, 1, 1),
                         (C, C, stride, stride)) / float(stride * stride)
    ref = jax.lax.conv_general_dilated(
        x, w, window_strides=(stride, stride), padding="VALID",
        dimension_numbers=("NCHW", "OIHW", "NCHW"))

    assert y.shape == ref.shape == (N, C, H // stride, W // stride)
    assert jnp.allclose(y, ref, atol=1e-5, rtol=1e-5), "mismatch vs reference"

    print("KERNEL_OK")
</pallas_src>

<mosaic_0001>
module attributes {stable_mosaic.version = 11 : i64} {
  func.func @_avgpool_kernel(%arg0: i32, %arg1: memref<4x8x2x16xf32, #tpu.memory_space<vmem>>, %arg2: memref<16x8xf32, #tpu.memory_space<vmem>>, %arg3: memref<4x8x8xf32, #tpu.memory_space<vmem>>) attributes {dimension_semantics = [#tpu.dimension_semantics<parallel>], iteration_bounds = array<i64: 2>, scalar_prefetch = 0 : i64, scratch_operands = 0 : i64, tpu.core_type = #tpu.core_type<tc>, window_params = [{transform_indices = @transform_0, window_bounds = array<i64: 4, 8, 2, 16>}, {pipeline_mode = #tpu.pipeline_mode<synchronous>, transform_indices = @transform_1, window_bounds = array<i64: 16, 8>}, {transform_indices = @transform_2, window_bounds = array<i64: 4, 8, 8>}]} {
    %c0 = arith.constant 0 : index
    %c0_0 = arith.constant 0 : index
    %c0_1 = arith.constant 0 : index
    %c0_2 = arith.constant 0 : index
    %0 = vector.load %arg1[%c0, %c0_0, %c0_1, %c0_2] : memref<4x8x2x16xf32, #tpu.memory_space<vmem>>, vector<4x8x1x16xf32>
    %1 = vector.shape_cast %0 : vector<4x8x1x16xf32> to vector<4x8x16xf32>
    %c0_3 = arith.constant 0 : index
    %c0_4 = arith.constant 0 : index
    %c1 = arith.constant 1 : index
    %c0_5 = arith.constant 0 : index
    %2 = vector.load %arg1[%c0_3, %c0_4, %c1, %c0_5] : memref<4x8x2x16xf32, #tpu.memory_space<vmem>>, vector<4x8x1x16xf32>
    %3 = vector.shape_cast %2 : vector<4x8x1x16xf32> to vector<4x8x16xf32>
    %4 = arith.addf %1, %3 : vector<4x8x16xf32>
    %5 = vector.shape_cast %4 : vector<4x8x16xf32> to vector<32x16xf32>
    %c0_6 = arith.constant 0 : index
    %c0_7 = arith.constant 0 : index
    %6 = vector.load %arg2[%c0_6, %c0_7] : memref<16x8xf32, #tpu.memory_space<vmem>>, vector<16x8xf32>
    %cst = arith.constant dense<0.000000e+00> : vector<32x8xf32>
    %7 = tpu.matmul %5, %6, %cst {dimension_numbers = #tpu.dot_dimension_numbers<[1], [0], [0], [1], [0, 0, 1, 1], [], []>} : vector<32x16xf32>, vector<16x8xf32>, vector<32x8xf32> -> vector<32x8xf32>
    %8 = vector.shape_cast %7 : vector<32x8xf32> to vector<4x8x8xf32>
    %c0_8 = arith.constant 0 : index
    %c0_9 = arith.constant 0 : index
    %c0_10 = arith.constant 0 : index
    %9 = vector.load %arg3[%c0_8, %c0_9, %c0_10] : memref<4x8x8xf32, #tpu.memory_space<vmem>>, vector<4x8x8xf32>
    tpu.vector_store %arg3[%c0_8, %c0_9, %c0_10], %8 {strides = array<i32>} : memref<4x8x8xf32, #tpu.memory_space<vmem>>, vector<4x8x8xf32>,
    return
  }
  func.func @transform_0(%arg0: i32) -> (i32, i32, i32, i32) {
    %c0_i32 = arith.constant 0 : i32
    %c0_i32_0 = arith.constant 0 : i32
    %c0_i32_1 = arith.constant 0 : i32
    %c0_i32_2 = arith.constant 0 : i32
    return %arg0, %c0_i32, %c0_i32_0, %c0_i32_1 : i32, i32, i32, i32
  }
  func.func @transform_1(%arg0: i32) -> (i32, i32) {
    %c0_i32 = arith.constant 0 : i32
    %c0_i32_0 = arith.constant 0 : i32
    %c0_i32_1 = arith.constant 0 : i32
    return %c0_i32, %c0_i32_0 : i32, i32
  }
  func.func @transform_2(%arg0: i32) -> (i32, i32, i32) {
    %c0_i32 = arith.constant 0 : i32
    %c0_i32_0 = arith.constant 0 : i32
    %c0_i32_1 = arith.constant 0 : i32
    return %arg0, %c0_i32, %c0_i32_0 : i32, i32, i32
  }
}

</mosaic_0001>

<bundles_post_ra>
// kernel: tpu_custom_call.1
= control target key start
LH: loop header
LB: loop body
LE: loop exit
PB: predicated region body
PF: predicated region fallthrough
CT: control target
= control target key end

     0   :  { %7 = vsyncpa [#allocation3], 0  ;;  %s919_s0 = inlined_call_operand.hbm [shape: f32[8,8,2,16], index: 0, kind: input, shape index: {}]   ;;  %s920_s1 = inlined_call_operand.vmem [shape: f32[16,8], index: 1, kind: input, shape index: {}]   ;;  %s921_s2 = inlined_call_operand.hbm [shape: f32[8,8,8], index: 2, kind: output, shape index: {}]  }
   0x1   :  { %9 = vsyncpa [#allocation3 + $0x1], 0 }
   0x2   :  { %10 = vsyncpa [#allocation4], 0 }
   0x3   :  { %12 = vsyncpa [#allocation4 + $0x1], 0  ;;  %s687_s9 = smov 0   ;;  %s689_s10 = smov 0  }
   0x4   :  { %s691_s11 = smov 0   ;;  %s693_s12 = smov 0  }
   0x5 LB: > { %s708_s13 = sadd.s32 4294967295, %s666_s12   ;;  %s492_s14 = sadd.s32 4294967294, %s666_s12   ;;  %s666_s12 = sphi %s693_s12, %s931_s12   ;;  %s662_s11 = sphi %s691_s11, %s930_s11   ;;  %s658_s10 = sphi %s689_s10, %s929_s10   ;;  %s654_s9 = sphi %s687_s9, %s928_s9  }
   0x6   : > { %s712_s15 = sadd.s32 1, %s666_s12   ;;  %s25_s16 = sadd.s32 1, %s662_s11 }
   0x7   : > { %s22_s17 = ssub.s32 %s666_s12, %s712_s15  ;;  %p32_p0 = scmp.ne.s32.totalorder %s662_s11, %s658_s10 }
   0x8   : > { %p23_p1 = scmp.eq.s32.totalorder %s22_s17, 0  ;;  %p33_p2 = scmp.eq.s32.totalorder %s666_s12, 0 }
   0x9   : > { %p38_p3 = scmp.ne.s32.totalorder %s658_s10, %s654_s9  ;;  %p39_p4 = scmp.eq.s32.totalorder %s708_s13, 0 }
   0xa   : > { %s724_s18 = scalar_select %p23_p1, %s662_s11, %s25_s16  }
   0xb   : > { %p726_p5 = por %p33_p2, %p32_p0  ;;  %p730_p6 = por %p39_p4, %p38_p3 }
   0xc   : > { %p83_p7 = scmp.eq.s32.totalorder %s708_s13, 1  ;;  %p89_p8 = scmp.eq.s32.totalorder %s492_s14, 1 }
   0xd   : > { %p532_p10 = scmp.lt.s32.totalorder %s666_s12, 2  ;;  %s112_s23 = sand.u32 1, %s662_s11  }
   0xe   : > { %p737_p11 = por %p83_p7, %p32_p0  ;;  %p741_p12 = por %p89_p8, %p38_p3 }
   0xf   : > { %s512_s24 = sshll.u32 %s666_s12, 6  ;;  %s495_s25 = sshll.u32 %s112_s23, 6 }
  0x10   : > { %s122_s28 = scalar_lea.hbm %s919_s0, %s512_s24  ;;  %s116_s30 = scalar_lea.vmem [#allocation2], %s495_s25 }
  0x11   : > { %s123_s29 = sshll.u32 %s122_s28, 4  ;;  %s125_s3 = sshll.u32 %s116_s30, 4  ;;  %s124_s29 = int_to_ptr.hbm [resolvable:$true] %s123_s29  ;;  %s126_s3 = int_to_ptr.vmem [resolvable:$true] %s125_s3 }
  0x12   : > { %p752_p13 = pnand %p532_p10, %p726_p5  ;;  %p499_p0 = scmp.ge.s32.totalorder %s666_s12, 1 }
  0x13   : > { %p133_p1 = scmp.lt.s32.totalorder %s666_s12, 3  ;;  %s113_s5 = scalar_lea.sflag [#allocation3], %s112_s23 }
  0x14   : > { %s570_s6 = sshra.s32 %s124_s29, 4  ;;  %p574_p3 = pneg %p752_p13  ;;  %s571_s6 = int_to_ptr.hbm [resolvable:$true] %s570_s6 }
  0x15   : > { %s572_s7 = scalar_lea.hbm %s571_s6, 64  ;;  %s577_s16 = scalar_lea.hbm %s919_s0, 128 }
  0x16   : > { %p573_p2 = scmp.ne.s32.totalorder %s571_s6, %s572_s7  ;;  %p578_p5 = scmp.lt.s32.totalorder %s571_s6, %s919_s0 }
  0x17   : > { %p579_p8 = scmp.lt.s32.totalorder %s577_s16, %s572_s7 }
  0x18   : > { %p575_p4 = pnand %p574_p3, %p573_p2 }
  0x19   : > { %p580_p10 = por %p579_p8, %p578_p5 }
  0x1a   : > { %p576_p7 = pneg %p575_p4 }
  0x1c   : > { %p581_p9 = pnand %p580_p10, %p576_p7 }
  0x1e   : > { %584 = shalt.err (!%p581_p9)
}
  0x1f   : > { %s668_s23 = smov 32   ;;  %s669_s24 = smov 2  }
  0x20   : > { %527 = dma.hbm_to_vmem [thread:$0]  (!%p752_p13), %s124_s29, 1024, %s126_s3, %s113_s5, %s668_s23, %s668_s23, %s669_s24  }
  0x21   : > { %p134_p2 = pnand %p499_p0, %p133_p1 }
  0x22   : > { %s773_s25 = sand.u32 (!%p134_p2), 1, %s658_s10  }
  0x23   : > { %137 = sbr.rel (%p134_p2) target bundleno = 208 (0xd0), region = 28  ;;  %s500_s26 = sshll.u32 (!%p134_p2), %s773_s25, 6 }
  0x24   : > { %s140_s27 = scalar_lea.sflag (!%p134_p2), [#allocation3], %s773_s25  ;;  %s777_s28 = scalar_lea.vmem (!%p134_p2), [#allocation2], %s500_s26 }
  0x28   : > { %645 = dma.done.wait (%p730_p6), %s140_s27, 1024  }
  0x29   : > { %647 = vsyncadd (%p730_p6), %s140_s27, 4294966272  ;;  %vm298_vm0 = vcmask 1041409   ;;  %vm301_vm1 = vcmask 1042434   ;;  %v264_v0 = vld [vmem:[%s920_s1 + $0x8] sm:$0xff]  ;;  %v263_v1 = vld [vmem:[%s920_s1] sm:$0xff]  ;;  %vm304_vm2 = vcmask 1043459  }
  0x2a   : > { %v183_v2 = vld [vmem:[%s777_s28 + $0x20] sm:$0x1]  ;;  %vm307_vm3 = vcmask 1044484   ;;  %515 = vmatpush.msra.mxu2 %v264_v0  ;;  %516 = vmatpush.msra.mxu3 %v264_v0  ;;  %v184_v3 = vld [vmem:[%s777_s28 + $0x22] sm:$0x1]  ;;  %vm310_vm4 = vcmask 1045509  }
  0x2b   : > { %v185_v4 = vld [vmem:[%s777_s28 + $0x24] sm:$0x1]  ;;  %v186_v5 = vld [vmem:[%s777_s28 + $0x26] sm:$0x1]  ;;  %v187_v6 = vld [vmem:[%s777_s28 + $0x28] sm:$0x1]  ;;  %383 = vmatpush.msra.mxu0 %v264_v0  ;;  %514 = vmatpush.msra.mxu1 %v264_v0 }
  0x2c   : > { %v188_v7 = vld [vmem:[%s777_s28 + $0x2a] sm:$0x1]  ;;  %v189_v8 = vld [vmem:[%s777_s28 + $0x2c] sm:$0x1]  ;;  %vm313_vm5 = vcmask 1046534   ;;  %518 = vmatpush.msra.mxu2 %v263_v1  ;;  %519 = vmatpush.msra.mxu3 %v263_v1  ;;  %vm316_vm6 = vcmask 1047559  }
  0x2d   : > { %v190_v9 = vld [vmem:[%s777_s28 + $0x2e] sm:$0x1]  ;;  %v215_v10 = vld [vmem:[%s777_s28 + $0x21] sm:$0x1]  ;;  %v216_v11 = vld [vmem:[%s777_s28 + $0x23] sm:$0x1]  ;;  %384 = vmatpush.msra.mxu0 %v263_v1  ;;  %517 = vmatpush.msra.mxu1 %v263_v1 }
  0x2e   : > { %v217_v12 = vld [vmem:[%s777_s28 + $0x25] sm:$0x1]  ;;  %v218_v13 = vld [vmem:[%s777_s28 + $0x27] sm:$0x1]  ;;  %v219_v14 = vld [vmem:[%s777_s28 + $0x29] sm:$0x1]  ;;  %v247_v15 = vadd.f32 %v215_v10, %v183_v2  ;;  %v248_v16 = vadd.f32 %v216_v11, %v184_v3 }
  0x2f   : > { %v220_v17 = vld [vmem:[%s777_s28 + $0x2b] sm:$0x1]  ;;  %v221_v18 = vld [vmem:[%s777_s28 + $0x2d] sm:$0x1]  ;;  %v222_v19 = vld [vmem:[%s777_s28 + $0x2f] sm:$0x1]  ;;  %v249_v20 = vadd.f32 %v217_v12, %v185_v4  ;;  %v250_v21 = vadd.f32 %v218_v13, %v186_v5  ;;  %v251_v22 = vadd.f32 %v219_v14, %v187_v6 }
  0x30   : > { %v252_v23 = vadd.f32 %v220_v17, %v188_v7  ;;  %v253_v24 = vadd.f32 %v221_v18, %v189_v8  ;;  %v254_v25 = vadd.f32 %v222_v19, %v190_v9  ;;  %v332_v26 = vrot.slane %v248_v16, 7  ;;  %v191_v27 = vld [vmem:[%s777_s28 + $0x30] sm:$0x1]  ;;  %v192_v28 = vld [vmem:[%s777_s28 + $0x32] sm:$0x1]  ;;  %s501_s20 = sshll.u32 %s773_s25, 5 }
  0x31   : > { %v334_v29 = vrot.slane %v249_v20, 6  ;;  %v336_v30 = vrot.slane %v250_v21, 5  ;;  %v338_v31 = vrot.slane %v251_v22, 4  ;;  %vm360_vm7 = vcmask 130048   ;;  %v193_v32 = vld [vmem:[%s777_s28 + $0x34] sm:$0x1] }
  0x32   : > { %v333_v33 = vsel %vm298_vm0, %v332_v26, %v247_v15  ;;  %v340_v34 = vrot.slane %v252_v23, 3  ;;  %v342_v35 = vrot.slane %v253_v24, 2  ;;  %v344_v36 = vrot.slane %v254_v25, 1  ;;  %v194_v37 = vld [vmem:[%s777_s28 + $0x36] sm:$0x1]  ;;  %s164_s5 = scalar_lea.vmem [#allocation5], %s501_s20 }
  0x33   : > { %v335_v38 = vsel %vm301_vm1, %v334_v29, %v333_v33  ;;  %v195_v39 = vld [vmem:[%s777_s28 + $0x38] sm:$0x1]  ;;  %v196_v40 = vld [vmem:[%s777_s28 + $0x3a] sm:$0x1]  ;;  %v197_v41 = vld [vmem:[%s777_s28 + $0x3c] sm:$0x1] }
  0x34   : > { %v337_v42 = vsel %vm304_vm2, %v336_v30, %v335_v38  ;;  %v198_v43 = vld [vmem:[%s777_s28 + $0x3e] sm:$0x1]  ;;  %v223_v44 = vld [vmem:[%s777_s28 + $0x31] sm:$0x1]  ;;  %v224_v45 = vld [vmem:[%s777_s28 + $0x33] sm:$0x1] }
  0x35   : > { %v339_v46 = vsel %vm307_vm3, %v338_v31, %v337_v42  ;;  %v225_v47 = vld [vmem:[%s777_s28 + $0x35] sm:$0x1]  ;;  %v226_v48 = vld [vmem:[%s777_s28 + $0x37] sm:$0x1]  ;;  %v227_v49 = vld [vmem:[%s777_s28 + $0x39] sm:$0x1]  ;;  %v255_v50 = vadd.f32 %v223_v44, %v191_v27  ;;  %v256_v51 = vadd.f32 %v224_v45, %v192_v28 }
  0x36   : > { %v341_v52 = vsel %vm310_vm4, %v340_v34, %v339_v46  ;;  %v228_v53 = vld [vmem:[%s777_s28 + $0x3b] sm:$0x1]  ;;  %v229_v54 = vld [vmem:[%s777_s28 + $0x3d] sm:$0x1]  ;;  %v230_v55 = vld [vmem:[%s777_s28 + $0x3f] sm:$0x1]  ;;  %v257_v56 = vadd.f32 %v225_v47, %v193_v32  ;;  %v258_v57 = vadd.f32 %v226_v48, %v194_v37  ;;  %v259_v58 = vadd.f32 %v227_v49, %v195_v39 }
  0x37   : > { %v343_v59 = vsel %vm313_vm5, %v342_v35, %v341_v52  ;;  %v260_v60 = vadd.f32 %v228_v53, %v196_v40  ;;  %v261_v61 = vadd.f32 %v229_v54, %v197_v41  ;;  %v262_v62 = vadd.f32 %v230_v55, %v198_v43  ;;  %v167_v63 = vld [vmem:[%s777_s28] sm:$0x1]  ;;  %v168_v0 = vld [vmem:[%s777_s28 + $0x2] sm:$0x1]  ;;  %v169_v1 = vld [vmem:[%s777_s28 + $0x4] sm:$0x1] }
  0x38   : > { %v345_v2 = vsel %vm316_vm6, %v344_v36, %v343_v59  ;;  %v346_v3 = vrot.slane %v256_v51, 7  ;;  %v348_v4 = vrot.slane %v257_v56, 6  ;;  %v350_v5 = vrot.slane %v258_v57, 5  ;;  %v170_v6 = vld [vmem:[%s777_s28 + $0x6] sm:$0x1]  ;;  %s513_s6 = sshll.u32 %s708_s13, 5 }
  0x39   : > { %504 = vmatmul.msk.f32.vlgmr.msra.gmra.mxu2 %vm360_vm7, %v345_v2  ;;  %v352_v7 = vrot.slane %v259_v58, 4  ;;  %v354_v8 = vrot.slane %v260_v60, 3  ;;  %v356_v9 = vrot.slane %v261_v61, 2  ;;  %v358_v10 = vrot.slane %v262_v62, 1  ;;  %v171_v11 = vld [vmem:[%s777_s28 + $0x8] sm:$0x1]  ;;  %s415_s14 = scalar_lea.hbm %s921_s2, %s513_s6 }
  0x3a   : > { %v347_v12 = vsel %vm298_vm0, %v346_v3, %v255_v50  ;;  %v172_v13 = vld [vmem:[%s777_s28 + $0xa] sm:$0x1]  ;;  %v173_v14 = vld [vmem:[%s777_s28 + $0xc] sm:$0x1]  ;;  %v174_v15 = vld [vmem:[%s777_s28 + $0xe] sm:$0x1] }
  0x3b   : > { %v349_v16 = vsel %vm301_vm1, %v348_v4, %v347_v12  ;;  %v199_v17 = vld [vmem:[%s777_s28 + $0x1] sm:$0x1]  ;;  %v200_v18 = vld [vmem:[%s777_s28 + $0x3] sm:$0x1]  ;;  %v201_v19 = vld [vmem:[%s777_s28 + $0x5] sm:$0x1] }
  0x3c   : > { %v351_v20 = vsel %vm304_vm2, %v350_v5, %v349_v16  ;;  %v202_v21 = vld [vmem:[%s777_s28 + $0x7] sm:$0x1]  ;;  %v203_v22 = vld [vmem:[%s777_s28 + $0x9] sm:$0x1]  ;;  %v204_v23 = vld [vmem:[%s777_s28 + $0xb] sm:$0x1]  ;;  %v231_v24 = vadd.f32 %v199_v17, %v167_v63  ;;  %v232_v25 = vadd.f32 %v200_v18, %v168_v0  ;;  %v233_v26 = vadd.f32 %v201_v19, %v169_v1 }
  0x3d   : > { %v353_v27 = vsel %vm307_vm3, %v352_v7, %v351_v20  ;;  %v205_v28 = vld [vmem:[%s777_s28 + $0xd] sm:$0x1]  ;;  %v206_v29 = vld [vmem:[%s777_s28 + $0xf] sm:$0x1]  ;;  %v234_v30 = vadd.f32 %v202_v21, %v170_v6  ;;  %v235_v31 = vadd.f32 %v203_v22, %v171_v11  ;;  %v236_v32 = vadd.f32 %v204_v23, %v172_v13  ;;  %v175_v37 = vld [vmem:[%s777_s28 + $0x10] sm:$0x1] }
  0x3e   : > { %v355_v33 = vsel %vm310_vm4, %v354_v8, %v353_v27  ;;  %v237_v34 = vadd.f32 %v205_v28, %v173_v14  ;;  %v238_v35 = vadd.f32 %v206_v29, %v174_v15  ;;  %v297_v36 = vrot.slane %v232_v25, 7  ;;  %v176_v38 = vld [vmem:[%s777_s28 + $0x12] sm:$0x1]  ;;  %v177_v39 = vld [vmem:[%s777_s28 + $0x14] sm:$0x1]  ;;  %s416_s16 = sshll.u32 %s164_s5, 4  ;;  %s417_s16 = int_to_ptr.vmem [resolvable:$true] %s416_s16 }
  0x3f   : > { %v357_v40 = vsel %vm313_vm5, %v356_v9, %v355_v33  ;;  %v300_v41 = vrot.slane %v233_v26, 6  ;;  %v303_v42 = vrot.slane %v234_v30, 5  ;;  %v306_v43 = vrot.slane %v235_v31, 4  ;;  %v178_v44 = vld [vmem:[%s777_s28 + $0x16] sm:$0x1]  ;;  %s418_s17 = sshll.u32 %s415_s14, 4  ;;  %s419_s17 = int_to_ptr.hbm [resolvable:$true] %s418_s17 }
  0x40   : > { %v359_v45 = vsel %vm316_vm6, %v358_v10, %v357_v40  ;;  %v299_v46 = vsel %vm298_vm0, %v297_v36, %v231_v24  ;;  %v309_v47 = vrot.slane %v236_v32, 3  ;;  %v179_v48 = vld [vmem:[%s777_s28 + $0x18] sm:$0x1]  ;;  %v180_v49 = vld [vmem:[%s777_s28 + $0x1a] sm:$0x1]  ;;  %v312_v51 = vrot.slane %v237_v34, 2 }
  0x41   : > { %505 = vmatmul.msk.f32.vlgmr.msra.gmra.mxu3 %vm360_vm7, %v359_v45  ;;  %v302_v50 = vsel %vm301_vm1, %v300_v41, %v299_v46  ;;  %v315_v52 = vrot.slane %v238_v35, 1  ;;  %v181_v53 = vld [vmem:[%s777_s28 + $0x1c] sm:$0x1]  ;;  %v182_v54 = vld [vmem:[%s777_s28 + $0x1e] sm:$0x1]  ;;  %vm398_vm8 = vcmask 64512  }
  0x42   : > { %v305_v55 = vsel %vm304_vm2, %v303_v42, %v302_v50  ;;  %v207_v56 = vld [vmem:[%s777_s28 + $0x11] sm:$0x1]  ;;  %v208_v57 = vld [vmem:[%s777_s28 + $0x13] sm:$0x1]  ;;  %v209_v58 = vld [vmem:[%s777_s28 + $0x15] sm:$0x1] }
  0x43   : > { %v308_v59 = vsel %vm307_vm3, %v306_v43, %v305_v55  ;;  %v210_v60 = vld [vmem:[%s777_s28 + $0x17] sm:$0x1]  ;;  %v211_v61 = vld [vmem:[%s777_s28 + $0x19] sm:$0x1]  ;;  %v212_v62 = vld [vmem:[%s777_s28 + $0x1b] sm:$0x1]  ;;  %v239_v63 = vadd.f32 %v207_v56, %v175_v37  ;;  %v240_v0 = vadd.f32 %v208_v57, %v176_v38  ;;  %v241_v1 = vadd.f32 %v209_v58, %v177_v39 }
  0x44   : > { %v311_v2 = vsel %vm310_vm4, %v309_v47, %v308_v59  ;;  %v213_v3 = vld [vmem:[%s777_s28 + $0x1d] sm:$0x1]  ;;  %v214_v4 = vld [vmem:[%s777_s28 + $0x1f] sm:$0x1]  ;;  %v242_v5 = vadd.f32 %v210_v60, %v178_v44  ;;  %v243_v6 = vadd.f32 %v211_v61, %v179_v48  ;;  %v244_v7 = vadd.f32 %v212_v62, %v180_v49  ;;  %s404_s19 = scalar_lea.sflag [#allocation4], %s773_s25  ;;  %s614_s23 = sshra.s32 %s419_s17, 4  ;;  %s615_s23 = int_to_ptr.hbm [resolvable:$true] %s614_s23 }
  0x45   : > { %v314_v8 = vsel %vm313_vm5, %v312_v51, %v311_v2  ;;  %v245_v9 = vadd.f32 %v213_v3, %v181_v53  ;;  %v246_v10 = vadd.f32 %v214_v4, %v182_v54  ;;  %v318_v11 = vrot.slane %v240_v0, 7  ;;  %s616_s24 = scalar_lea.hbm %s615_s23, 32  ;;  %s620_s27 = scalar_lea.hbm %s921_s2, 64 }
  0x46   : > { %v317_v12 = vsel %vm316_vm6, %v315_v52, %v314_v8  ;;  %v320_v13 = vrot.slane %v241_v1, 6  ;;  %v322_v14 = vrot.slane %v242_v5, 5  ;;  %v324_v15 = vrot.slane %v243_v6, 4  ;;  %p617_p6 = scmp.ne.s32.totalorder %s615_s23, %s616_s24  ;;  %p621_p0 = scmp.lt.s32.totalorder %s615_s23, %s921_s2 }
  0x47   : > { %502 = vmatmul.msk.f32.vlgmr.msra.gmra.mxu0 %vm360_vm7, %v317_v12  ;;  %v319_v16 = vsel %vm298_vm0, %v318_v11, %v239_v63  ;;  %v326_v17 = vrot.slane %v244_v7, 3  ;;  %v328_v19 = vrot.slane %v245_v9, 2  ;;  %v330_v21 = vrot.slane %v246_v10, 1  ;;  %p622_p1 = scmp.lt.s32.totalorder %s620_s27, %s616_s24 }
  0x48   : > { %v321_v18 = vsel %vm301_vm1, %v320_v13, %v319_v16  ;;  %p618_p9 = pnand %p617_p6, %p737_p11 }
  0x49   : > { %v323_v20 = vsel %vm304_vm2, %v322_v14, %v321_v18  ;;  %p623_p3 = por %p622_p1, %p621_p0 }
  0x4a   : > { %v325_v22 = vsel %vm307_vm3, %v324_v15, %v323_v20  ;;  %p619_p13 = pneg %p618_p9 }
  0x4b   : > { %v327_v23 = vsel %vm310_vm4, %v326_v17, %v325_v22 }
  0x4c   : > { %v329_v24 = vsel %vm313_vm5, %v328_v19, %v327_v23  ;;  %p624_p4 = pnand %p623_p3, %p619_p13 }
  0x4d   : > { %v331_v25 = vsel %vm316_vm6, %v330_v21, %v329_v24 }
  0x4e   : > { %503 = vmatmul.msk.f32.vlgmr.msra.gmra.mxu1 %vm360_vm7, %v331_v25 }
  0xbc   : > { %v392_v26 = vpop.f32.mrf.mxu2 }
  0xbd   : > { %401 = vst.msk [vmem:[%s164_s5 + $0x10] sm:$0xff] %vm398_vm8, %v392_v26 }
  0xc4   : > { %v386_v27 = vpop.f32.mrf.mxu0  ;;  %v395_v28 = vpop.f32.mrf.mxu3 }
  0xc5   : > { %399 = vst.msk [vmem:[%s164_s5] sm:$0xff] %vm398_vm8, %v386_v27 }
  0xc6   : > { %402 = vst.msk [vmem:[%s164_s5 + $0x18] sm:$0xff] %vm398_vm8, %v395_v28 }
  0xcb   : > { %v389_v29 = vpop.f32.mrf.mxu1 }
  0xcc   : > { %400 = vst.msk [vmem:[%s164_s5 + $0x8] sm:$0xff] %vm398_vm8, %v389_v29 }
  0xcd   : > { %627 = shalt.err (!%p624_p4)
}
  0xce   : > { %s670_s25 = smov 128   ;;  %s671_s30 = smov 8  }
  0xcf   : > { %522 = dma.vmem_to_hbm [thread:$0]  (%p737_p11), %s417_s16, 512, %s419_s17, %s404_s19, %s670_s25, %s670_s25, %s671_s30  }
  0xd0 PF: > { %s433_s3 = sand.u32 1, %s654_s9   ;;  %p927_p7 = scmp.ge.s32.totalorder %s666_s12, 2 }
  0xd1   : > { %s434_s4 = scalar_lea.sflag [#allocation4], %s433_s3 }
  0xd2   : > { %p529_p5 = pnand %p927_p7, %p741_p12 }
  0xd4   : > { %p530_p8 = pneg %p529_p5 }
  0xd6   : > { %649 = dma.done.wait (%p530_p8), %s434_s4, 512  }
  0xd7   : > { %651 = vsyncadd (%p530_p8), %s434_s4, 4294966784  ;;  %p15_p10 = scmp.ge.s32.totalorder %s712_s15, 4   ;;  %s928_s9 = smov %s658_s10 }
  0xd8   : > { %s929_s10 = smov %s662_s11  ;;  %s930_s11 = smov %s724_s18 }
  0xd9   : > { %s931_s12 = smov %s712_s15  ;;  %17 = sbr.rel (!%p15_p10) target bundleno = 5 (0x5), region = 73 }
  0xde   :  { %440 = vsyncpa [#allocation3], 1 }
  0xdf   :  { %442 = vsyncpa [#allocation3 + $0x1], 1 }
  0xe0   :  { %443 = vsyncpa [#allocation4], 1 }
  0xe1   :  { %445 = vsyncpa [#allocation4 + $0x1], 1 }

</bundles_post_ra>
